<compile_context>
chip_gen: v7x
topology: tpu7x:2x2x1
jax: 0.10.0
libtpu: 0.0.40
codegen_flags: <defaults>
</compile_context>

<pallas_src>
import jax
import jax.numpy as jnp
from jax.experimental import pallas as pl
from jax.experimental.pallas import tpu as pltpu


def _cond_kernel(u_ref, w_ref, add_ref, o_ref):
    # u_ref   : VMEM (TM, C)  f32   units row tile (cast to the weight dtype in VMEM)
    # w_ref   : VMEM (C, H)   bf16  unit_embed weight (stored transposed), grid-invariant
    # add_ref : VMEM (1, H)   f32   bias (+ spk_embed row) for this batch element
    # o_ref   : VMEM (TM, H)        output conditioning tile (bf16 by default)
    u = u_ref[...].astype(w_ref.dtype)                                       # free VPU cast
    x = jnp.dot(u, w_ref[...], preferred_element_type=jnp.float32)           # MXU, f32 acc
    o_ref[...] = (x + add_ref[...]).astype(o_ref.dtype)                      # f32 add, cast store


def _pick_row_tile(B, T, target_steps=8):
    # DMA-bound layer: bigger row tiles -> better HBM pipeline efficiency (measured ~63% of
    # roofline at 256 rows vs ~85% at 512 on v6e), but only if there are enough grid steps
    # for the double-buffer to overlap and for both v7x TensorCores to get >= a few tiles.
    for tm in (512, 256, 128):
        if B * pl.cdiv(T, tm) >= target_steps:
            return tm
    return 128


def unit2mel_conditioning(units, spk_id, w, bias, spk_table, *,
                          tm=None,
                          compute_dtype=jnp.bfloat16,
                          out_dtype=jnp.bfloat16):
    """Fused unit_embed + speaker-embedding add.

    units:     (B, T, C) float32 (or bf16)
    spk_id:    (B,) int32, 1-based (as in the PyTorch forward); ignored if spk_table is None
    w:         (C, H) float32  -- nn.Linear(C, H) weight, stored transposed
    bias:      (H,)   float32
    spk_table: (n_spk, H) float32 or None (n_spk <= 1: module skips spk_embed)
    Returns (B, T, H) out_dtype (bf16 by default; pass jnp.float32 for full module parity).
    """
    B, T, C = units.shape
    H = w.shape[1]
    if tm is None:
        tm = _pick_row_tile(B, T)

    # Per-batch additive row: bias (+ spk_embed(spk_id - 1) when n_spk > 1), kept in f32.
    # NOTE: clip silently remaps out-of-range speaker ids (nn.Embedding would raise).
    if spk_table is not None:
        n_spk = spk_table.shape[0]
        idx = jnp.clip(spk_id.astype(jnp.int32) - 1, 0, n_spk - 1)
        combined = bias[None, :] + spk_table[idx]                 # (B, H)
    else:
        combined = jnp.broadcast_to(bias[None, :], (B, H))
    combined = combined.astype(jnp.float32).reshape(B, 1, H)      # (B, 1, H)

    # Only the (tiny, grid-invariant) weight is pre-cast; units are cast inside the kernel.
    w_c = w.astype(compute_dtype)

    n_t = pl.cdiv(T, tm)
    out = pl.pallas_call(
        _cond_kernel,
        out_shape=jax.ShapeDtypeStruct((B, T, H), out_dtype),
        grid=(B, n_t),
        in_specs=[
            # Leading batch dim squeezed -> kernel sees clean 2-D tiles.
            pl.BlockSpec((None, tm, C), lambda b, t: (b, t, 0)),      # units row tile (f32)
            pl.BlockSpec((C, H), lambda b, t: (0, 0)),                # weight (grid-invariant)
            pl.BlockSpec((None, 1, H), lambda b, t: (b, 0, 0)),       # bias + spk row
        ],
        out_specs=pl.BlockSpec((None, tm, H), lambda b, t: (b, t, 0)),
        compiler_params=pltpu.CompilerParams(
            # Both axes independent -> shard across v7x's two TensorCores (neutral v5e/v6e).
            dimension_semantics=("parallel", "parallel"),
            # Tiles need ~1 MiB double-buffered at TM=512; 32 MiB is safe on every generation
            # (v5e/v6e 128 MiB, v7x 64 MiB physical).
            vmem_limit_bytes=32 * 1024 * 1024,
        ),
    )(units, w_c, combined)

    return out


if __name__ == "__main__":
    # Small shapes consistent with the module (n_hidden=256 default, C=input_channel).
    # T is intentionally not a multiple of the row tile to exercise the masked partial block.
    B, T, C, H, n_spk = 2, 200, 128, 256, 4

    key = jax.random.PRNGKey(0)
    k1, k2, k3, k4 = jax.random.split(key, 4)

    units = jax.random.normal(k1, (B, T, C), dtype=jnp.float32)
    # unit_embed: nn.Linear(C, H) -> weight (H, C), bias (H,). Stored transposed as (C, H).
    w = jax.random.normal(k2, (C, H), dtype=jnp.float32) * 0.02
    bias = jax.random.normal(k3, (H,), dtype=jnp.float32) * 0.02
    # spk_embed: nn.Embedding(n_spk, H)
    spk_table = jax.random.normal(k4, (n_spk, H), dtype=jnp.float32)
    spk_id = jnp.array([1, 3], dtype=jnp.int32)  # 1-based, as in the PyTorch forward

    out = unit2mel_conditioning(units, spk_id, w, bias, spk_table)
    out = jax.block_until_ready(out)

    # Pure-JAX f32 reference for the conditioning path (volume == 0, aug_shift skipped).
    ref = jnp.einsum("btc,ch->bth", units, w) + bias[None, None, :]
    ref = ref + spk_table[spk_id - 1][:, None, :]

    assert out.shape == (B, T, H)
    assert out.dtype == jnp.bfloat16
    # bf16 MXU inputs + bf16 output store -> loose tolerance vs. the full-f32 reference.
    assert jnp.allclose(out.astype(jnp.float32), ref, atol=3e-2, rtol=3e-2)

    # TODO(synk): GaussianDiffusion(UNet1DConditionModel) decoder (diffusion sampling loop,
    # 1-D UNet with cross-attention) is an external module not defined in the provided code
    # and is not translated here; `out` is the conditioning tensor fed to it.

    print("KERNEL_OK")
</pallas_src>

<mosaic_0001>
module attributes {stable_mosaic.version = 11 : i64} {
  func.func @_cond_kernel(%arg0: i32, %arg1: i32, %arg2: memref<1x128x128xf32, #tpu.memory_space<vmem>>, %arg3: memref<128x256xbf16, #tpu.memory_space<vmem>>, %arg4: memref<1x1x256xf32, #tpu.memory_space<vmem>>, %arg5: memref<1x128x256xbf16, #tpu.memory_space<vmem>>) attributes {dimension_semantics = [#tpu.dimension_semantics<parallel>, #tpu.dimension_semantics<parallel>], iteration_bounds = array<i64: 2, 2>, scalar_prefetch = 0 : i64, scratch_operands = 0 : i64, tpu.core_type = #tpu.core_type<tc>, window_params = [{transform_indices = @transform_0, window_bounds = array<i64: 1, 128, 128>}, {pipeline_mode = #tpu.pipeline_mode<synchronous>, transform_indices = @transform_1, window_bounds = array<i64: 128, 256>}, {transform_indices = @transform_2, window_bounds = array<i64: 1, 1, 256>}, {transform_indices = @transform_3, window_bounds = array<i64: 1, 128, 256>}]} {
    %c0 = arith.constant 0 : index
    %c0_0 = arith.constant 0 : index
    %c0_1 = arith.constant 0 : index
    %0 = vector.load %arg2[%c0, %c0_0, %c0_1] : memref<1x128x128xf32, #tpu.memory_space<vmem>>, vector<1x128x128xf32>
    %1 = vector.shape_cast %0 : vector<1x128x128xf32> to vector<128x128xf32>
    %2 = arith.truncf %1 : vector<128x128xf32> to vector<128x128xbf16>
    %c0_2 = arith.constant 0 : index
    %c0_3 = arith.constant 0 : index
    %3 = vector.load %arg3[%c0_2, %c0_3] : memref<128x256xbf16, #tpu.memory_space<vmem>>, vector<128x256xbf16>
    %cst = arith.constant dense<0.000000e+00> : vector<128x256xf32>
    %4 = tpu.matmul %2, %3, %cst {dimension_numbers = #tpu.dot_dimension_numbers<[1], [0], [0], [1], [0, 0, 1, 1], [], []>} : vector<128x128xbf16>, vector<128x256xbf16>, vector<128x256xf32> -> vector<128x256xf32>
    %c0_4 = arith.constant 0 : index
    %c0_5 = arith.constant 0 : index
    %c0_6 = arith.constant 0 : index
    %5 = vector.load %arg4[%c0_4, %c0_5, %c0_6] : memref<1x1x256xf32, #tpu.memory_space<vmem>>, vector<1x1x256xf32>
    %6 = vector.shape_cast %5 : vector<1x1x256xf32> to vector<1x256xf32>
    %7 = vector.broadcast %6 : vector<1x256xf32> to vector<128x256xf32>
    %8 = arith.addf %4, %7 : vector<128x256xf32>
    %9 = arith.truncf %8 : vector<128x256xf32> to vector<128x256xbf16>
    %c0_7 = arith.constant 0 : index
    %c0_8 = arith.constant 0 : index
    %c0_9 = arith.constant 0 : index
    %10 = vector.load %arg5[%c0_7, %c0_8, %c0_9] : memref<1x128x256xbf16, #tpu.memory_space<vmem>>, vector<1x128x256xbf16>
    %11 = vector.shape_cast %10 : vector<1x128x256xbf16> to vector<128x256xbf16>
    %12 = vector.shape_cast %9 : vector<128x256xbf16> to vector<1x128x256xbf16>
    tpu.vector_store %arg5[%c0_7, %c0_8, %c0_9], %12 {strides = array<i32>} : memref<1x128x256xbf16, #tpu.memory_space<vmem>>, vector<1x128x256xbf16>,
    return
  }
  func.func @transform_0(%arg0: i32, %arg1: i32) -> (i32, i32, i32) {
    %c0_i32 = arith.constant 0 : i32
    %c0_i32_0 = arith.constant 0 : i32
    return %arg0, %arg1, %c0_i32 : i32, i32, i32
  }
  func.func @transform_1(%arg0: i32, %arg1: i32) -> (i32, i32) {
    %c0_i32 = arith.constant 0 : i32
    %c0_i32_0 = arith.constant 0 : i32
    %c0_i32_1 = arith.constant 0 : i32
    return %c0_i32, %c0_i32_0 : i32, i32
  }
  func.func @transform_2(%arg0: i32, %arg1: i32) -> (i32, i32, i32) {
    %c0_i32 = arith.constant 0 : i32
    %c0_i32_0 = arith.constant 0 : i32
    %c0_i32_1 = arith.constant 0 : i32
    return %arg0, %c0_i32, %c0_i32_0 : i32, i32, i32
  }
  func.func @transform_3(%arg0: i32, %arg1: i32) -> (i32, i32, i32) {
    %c0_i32 = arith.constant 0 : i32
    %c0_i32_0 = arith.constant 0 : i32
    return %arg0, %arg1, %c0_i32 : i32, i32, i32
  }
}

</mosaic_0001>

<bundles_post_ra>
// kernel: tpu_custom_call.1
= control target key start
LH: loop header
LB: loop body
LE: loop exit
PB: predicated region body
PF: predicated region fallthrough
CT: control target
= control target key end

     0   :  { %s1486_s0 = inlined_call_operand.hbm [shape: f32[2,200,128], index: 0, kind: input, shape index: {}]   ;;  %s1487_s1 = inlined_call_operand.hbm [shape: bf16[128,256], index: 1, kind: input, shape index: {}]   ;;  %s1488_s2 = inlined_call_operand.vmem [shape: f32[2,1,256], index: 2, kind: input, shape index: {}]   ;;  %s1489_s3 = inlined_call_operand.hbm [shape: bf16[2,200,256], index: 3, kind: output, shape index: {}]  }
   0x1   :  { %1496 = sst [smem:[#allocation13_spill]] %s1487_s1 }
   0x2   :  { %8 = vsyncpa [#allocation3], 0 }
   0x3   :  { %10 = vsyncpa [#allocation3 + $0x1], 0 }
   0x4   :  { %11 = vsyncpa [#allocation6], 0 }
   0x5   :  { %12 = vsyncpa [#allocation4], 0 }
   0x6   :  { %14 = vsyncpa [#allocation4 + $0x1], 0  ;;  %s1149_s12 = smov 0   ;;  %s1151_s13 = smov 0  }
   0x7   :  { %s1153_s14 = smov 0   ;;  %s1155_s15 = smov 0  }
   0x8   :  { %s1157_s16 = smov 0   ;;  %s1159_s17 = smov 0  }
   0x9   :  { %s1161_s18 = smov 0   ;;  %s1163_s19 = smov 0  }
   0xa LB: > { %s750_s20 = sadd.s32 4294967295, %s1117_s19   ;;  %s751_s21 = sadd.s32 4294967294, %s1117_s19   ;;  %s1117_s19 = sphi %s1163_s19, %s20_s19   ;;  %s1113_s18 = sphi %s1161_s18, %s1521_s18   ;;  %s1109_s17 = sphi %s1159_s17, %s1520_s17   ;;  %s1105_s16 = sphi %s1157_s16, %s1519_s16   ;;  %s1101_s15 = sphi %s1155_s15, %s1518_s15   ;;  %s1097_s14 = sphi %s1153_s14, %s1517_s14   ;;  %s1093_s13 = sphi %s1151_s13, %s1516_s13   ;;  %s1089_s12 = sphi %s1149_s12, %s1515_s12  }
   0xb   : > { %s29_s22 = sadd.s32 1, %s1109_s17  ;;  %s32_s23 = sadd.s32 1, %s1113_s18 }
   0xc   : > { %p30_p0 = scmp.ge.s32.totalorder %s29_s22, 2  ;;  %s41_s24 = sadd.s32 1, %s1097_s14 }
   0xd   : > { %p48_p1 = scmp.ne.s32.totalorder %s1097_s14, %s1093_s13  ;;  %p49_p2 = scmp.eq.s32.totalorder %s1117_s19, 0 }
   0xe   : > { %s1523_s22 = smov (%p30_p0, %s29_s22), 0  ;;  %s1525_s23 = smov (!%p30_p0, %s32_s23), %s1113_s18 }
   0xf   : > { %1497 = sst [smem:[#allocation11_spill]] %s1523_s22  ;;  %s37_s25 = ssub.s32 %s1109_s17, %s1523_s22 }
  0x10   : > { %p1202_p3 = por %p49_p2, %p48_p1  ;;  %p34_p4 = scmp.ge.s32.totalorder %s1525_s23, 2 }
  0x11   : > { %p54_p5 = scmp.ne.s32.totalorder %s1093_s13, %s1089_s12  ;;  %p1208_p6 = scmp.eq.s32.totalorder %s750_s20, 0 }
  0x12   : > { %s1498_s26 = scalar_select %p1202_p3, 1, 0 }
  0x13   : > { %s1499_s27 = scalar_select %p1208_p6, 1, 0 }
  0x14   : > { %p127_p7 = scmp.eq.s32.totalorder %s750_s20, 3  ;;  %s1527_s23 = smov (%p34_p4, %s1525_s23), 0 }
  0x15   : > { %1500 = sst [smem:[#allocation12_spill]] %s1527_s23  ;;  %p1216_p8 = por %p1208_p6, %p54_p5 }
  0x16   : > { %p1220_p9 = por %p127_p7, %p48_p1  ;;  %s36_s30 = ssub.s32 %s1113_s18, %s1527_s23 }
  0x17   : > { %s1501_s28 = scalar_select %p1216_p8, 1, 0 }
  0x18   : > { %s1502_s29 = scalar_select %p1220_p9, 1, 0 }
  0x19   : > { %p133_p10 = scmp.eq.s32.totalorder %s751_s21, 3  ;;  %s38_s4 = sor.u32 %s37_s25, %s36_s30 }
  0x1a   : > { %p752_p11 = scmp.ge.s32.totalorder %s1117_s19, 1  ;;  %p39_p12 = scmp.eq.s32.totalorder %s38_s4, 0 }
  0x1b   : > { %p1227_p13 = por %p133_p10, %p54_p5  ;;  %p140_p0 = scmp.lt.s32.totalorder %s1117_s19, 5 }
  0x1c   : > { %s1233_s6 = scalar_select %p39_p12, %s1097_s14, %s41_s24  }
  0x1d   : > { %s1503_s5 = scalar_select %p1227_p13, 1, 0 }
  0x1e   : > { %p1235_p2 = pnand %p752_p11, %p140_p0  ;;  %s1119_s8 = smov [#allocation5]  }
  0x1f   : > { %s152_s9 = sshll.u32 %s1119_s8, 4  ;;  %s1506_s1 = sld [smem:[#allocation13_spill]]  ;;  %s153_s9 = int_to_ptr.vmem [resolvable:$true] %s152_s9 }
  0x20   : > { %s1504_s7 = scalar_select %p1235_p2, 1, 0 }
  0x21   : > { %p852_p1 = pneg %p1235_p2 }
  0x23   : > { %p1243_p4 = pnand %p852_p1, %p1208_p6 }
  0x25   : > { %s959_s21 = scalar_lea.hbm %s1506_s1, 2048  ;;  %p961_p7 = pneg %p1243_p4 }
  0x26   : > { %p960_p5 = scmp.ne.s32.totalorder %s1506_s1, %s959_s21  ;;  %p966_p12 = scmp.lt.u32.totalorder %s959_s21, %s1506_s1 }
  0x28   : > { %p962_p10 = pnand %p961_p7, %p960_p5 }
  0x2a   : > { %p963_p11 = pneg %p962_p10 }
  0x2c   : > { %p968_p0 = pnand %p966_p12, %p963_p11 }
  0x2e   : > { %971 = shalt.err (!%p968_p0)
}
  0x2f   : > { %s972_s8 = scalar_lea.vmem %s153_s9, 2048  ;;  %p980_p6 = scmp.lt.s32.totalorder %s153_s9, %s153_s9 }
  0x30   : > { %p973_p1 = scmp.ne.s32.totalorder %s153_s9, %s972_s8  ;;  %p981_p8 = scmp.lt.s32.totalorder %s972_s8, %s972_s8 }
  0x32   : > { %p975_p13 = pnand %p973_p1, %p961_p7  ;;  %p982_p2 = por %p981_p8, %p980_p6 }
  0x34   : > { %p976_p9 = pneg %p975_p13 }
  0x36   : > { %p983_p3 = pnand %p982_p2, %p976_p9 }
  0x38   : > { %986 = shalt.err (!%p983_p3)
}
  0x39   : > { %s1120_s11 = smov 128   ;;  %s1121_s20 = smov 8  }
  0x3a   : > { %855 = dma.hbm_to_vmem [thread:$0]  (!%p1243_p4), %s1506_s1, 2048, %s153_s9, [#allocation6], %s1120_s11, %s1120_s11, %s1121_s20  }
  0x3b   : > { %p754_p5 = scmp.ge.s32.totalorder %s1117_s19, 4 }
  0x3c   : > { %p1507_p10 = scmp.ne.s32.totalorder (!%p754_p5), %s1498_s26, 0 }
  0x3d   : > { %162 = sbr.rel (%p754_p5) target bundleno = 105 (0x69), region = 20 }
  0x44   : > { %165 = sbr.rel (!%p1507_p10) target bundleno = 105 (0x69), region = 24  ;;  %s166_s21 = sand.u32 (%p1507_p10), 1, %s1097_s14  }
  0x45   : > { %s756_s30 = sshll.u32 (%p1507_p10), %s1109_s17, 4  ;;  %s755_s4 = sshll.u32 (%p1507_p10), %s166_s21, 7 }
  0x46   : > { %s172_s8 = ssub.s32 (%p1507_p10), 25, %s756_s30  ;;  %s1271_s24 = scalar_lea.sflag (%p1507_p10), [#allocation3], %s166_s21 }
  0x47   : > { %p173_p3 = scmp.lt.s32.totalorder (%p1507_p10), %s172_s8, 16  ;;  %s170_s9 = scalar_lea.vmem (%p1507_p10), [#allocation2], %s755_s4 }
  0x4b   : > { %s1529_s8 = smov (!%p173_p3, %s172_s8), 16 }
  0x4c   : > { %s1268_s23 = sshll.u32 %s1529_s8, 7 }
  0x4d   : > { %s177_s10 = ssub.s32 2048, %s1268_s23 }
  0x4e   : > { %178 = vsyncadd %s1271_s24, %s177_s10  ;;  %p758_p6 = scmp.ne.s32.totalorder %s1268_s23, 0  ;;  %s844_s26 = smul.u32 25, %s1113_s18 }
  0x4f   : > { %s185_s11 = sshll.u32 %s170_s9, 4  ;;  %s1276_s11 = int_to_ptr.vmem [resolvable:$true] %s185_s11 }
  0x50   : > { %s181_s20 = sadd.s32 %s844_s26, %s756_s30  ;;  %s991_s30 = scalar_lea.hbm %s1486_s0, 6400 }
  0x51   : > { %s759_s25 = sshll.u32 %s181_s20, 7 }
  0x52   : > { %s1281_s22 = scalar_lea.hbm %s1486_s0, %s759_s25 }
  0x53   : > { %s987_s21 = scalar_lea.hbm %s1281_s22, %s1268_s23  ;;  %p992_p2 = scmp.lt.u32.totalorder %s1281_s22, %s1486_s0 }
  0x54   : > { %p988_p8 = scmp.ne.s32.totalorder %s1281_s22, %s987_s21  ;;  %p993_p4 = scmp.lt.u32.totalorder %s991_s30, %s987_s21 }
  0x55   : > { %p995_p11 = scmp.lt.u32.totalorder %s987_s21, %s1281_s22 }
  0x56   : > { %p989_p9 = pnand %p988_p8, %p758_p6  ;;  %p994_p7 = por %p993_p4, %p992_p2 }
  0x58   : > { %p990_p13 = pneg %p989_p9  ;;  %p996_p12 = por %p995_p11, %p994_p7 }
  0x5a   : > { %p997_p0 = pnand %p996_p12, %p990_p13 }
  0x5c   : > { %1000 = shalt.err (!%p997_p0)
}
  0x5d   : > { %s1001_s1 = scalar_lea.vmem %s1276_s11, %s1268_s23  ;;  %s1122_s20 = smov [#allocation2]  }
  0x5e   : > { %p1002_p1 = scmp.ne.s32.totalorder %s1276_s11, %s1001_s1  ;;  %s1005_s25 = sshll.u32 %s1122_s20, 4  ;;  %s1006_s25 = int_to_ptr.vmem [resolvable:$false] %s1005_s25 }
  0x5f   : > { %s1007_s8 = scalar_lea.vmem %s1006_s25, 4096  ;;  %p1008_p3 = scmp.lt.s32.totalorder %s1276_s11, %s1006_s25 }
  0x60   : > { %p1003_p5 = pnand %p1002_p1, %p758_p6  ;;  %p1009_p8 = scmp.lt.s32.totalorder %s1007_s8, %s1001_s1 }
  0x62   : > { %p1004_p10 = pneg %p1003_p5  ;;  %p1010_p9 = por %p1009_p8, %p1008_p3 }
  0x64   : > { %p1011_p2 = pnand %p1010_p9, %p1004_p10 }
  0x66   : > { %1014 = shalt.err (!%p1011_p2)
}
  0x67   : > { %s1123_s21 = smov 128   ;;  %s1124_s4 = smov 8  }
  0x68   : > { %191 = dma.hbm_to_vmem [thread:$0]  (%p758_p6), %s1281_s22, %s1268_s23, %s1276_s11, %s1271_s24, %s1123_s21, %s1123_s21, %s1124_s4  }
  0x69 PF: > { %p1508_p13 = scmp.ne.s32.totalorder %s1504_s7, 0 }
  0x6a   : > { %s1311_s10 = sand.u32 (!%p1508_p13), 1, %s1093_s13   ;;  %p1509_p4 = scmp.ne.s32.totalorder (!%p1508_p13), %s1501_s28, 0 }
  0x6b   : > { %204 = sbr.rel (%p1508_p13) target bundleno = 426 (0x1aa), region = 32  ;;  %s763_s30 = sshll.u32 (!%p1508_p13), %s1311_s10, 7 }
  0x6c   : > { %s207_s9 = scalar_lea.sflag (!%p1508_p13), [#allocation3], %s1311_s10  ;;  %s1317_s26 = scalar_lea.vmem (!%p1508_p13), [#allocation2], %s763_s30 }
  0x72   : > { %1076 = dma.done.wait (%p1509_p4), %s207_s9, 2048  }
  0x73   : > { %1078 = vsyncadd (%p1509_p4), %s207_s9, 4294965248  ;;  %p1510_p6 = scmp.ne.s32.totalorder %s1499_s27, 0 }
  0x75   : > { %1080 = dma.done.wait (%p1510_p6), [#allocation6], 2048  }
  0x76   : > { %1082 = vsyncadd (%p1510_p6), [#allocation6], 4294965248  ;;  %v1125_v0 = vmov 0   ;;  %v935_v1 = vld [vmem:[#allocation5 + $0x4] ss:$8 sps:$4 sm:$0xff]   ;;  %v259_v23 = vld [vmem:[%s1317_s26 + $0x10] sm:$0xff]  ;;  %v299_v41 = vlaneseq }
  0x77   : > { %421 = vmatprep.mubr.bf16.mxu0 %v1125_v0  ;;  %461 = vmatprep.mubr.bf16.mxu1 %v1125_v0  ;;  %v937_v2 = vld [vmem:[#allocation5] ss:$8 sps:$4 sm:$0xff]   ;;  %v938_v3 = vld [vmem:[#allocation5 + $0x14] ss:$8 sps:$4 sm:$0xff]   ;;  %v940_v4 = vld [vmem:[#allocation5 + $0x10] ss:$8 sps:$4 sm:$0xff]  }
  0x78   : > { %389 = vmatprep.subr.bf16.mxu0 %v935_v1  ;;  %828 = vmatprep.subr.bf16.mxu1 %v935_v1  ;;  %v941_v5 = vld [vmem:[#allocation5 + $0x24] ss:$8 sps:$4 sm:$0xff]   ;;  %v943_v6 = vld [vmem:[#allocation5 + $0x20] ss:$8 sps:$4 sm:$0xff]   ;;  %v944_v7 = vld [vmem:[#allocation5 + $0x34] ss:$8 sps:$4 sm:$0xff]  }
  0x79   : > { %390 = vmatpush1.bf16.msra.mxu0 %v937_v2  ;;  %836 = vmatpush1.bf16.msra.mxu1 %v937_v2  ;;  %v946_v8 = vld [vmem:[#allocation5 + $0x30] ss:$8 sps:$4 sm:$0xff]   ;;  %v947_v9 = vld [vmem:[#allocation5 + $0x44] ss:$8 sps:$4 sm:$0xff]   ;;  %v949_v10 = vld [vmem:[#allocation5 + $0x40] ss:$8 sps:$4 sm:$0xff]  }
  0x7a   : > { %391 = vmatprep.subr.bf16.mxu0 %v938_v3  ;;  %829 = vmatprep.subr.bf16.mxu1 %v938_v3  ;;  %v950_v11 = vld [vmem:[#allocation5 + $0x54] ss:$8 sps:$4 sm:$0xff]   ;;  %v952_v12 = vld [vmem:[#allocation5 + $0x50] ss:$8 sps:$4 sm:$0xff]   ;;  %v953_v13 = vld [vmem:[#allocation5 + $0x64] ss:$8 sps:$4 sm:$0xff]  }
  0x7b   : > { %v955_v14 = vld [vmem:[#allocation5 + $0x60] ss:$8 sps:$4 sm:$0xff]   ;;  %v956_v15 = vld [vmem:[#allocation5 + $0x74] ss:$8 sps:$4 sm:$0xff]   ;;  %v958_v16 = vld [vmem:[#allocation5 + $0x70] ss:$8 sps:$4 sm:$0xff]  }
  0x7c   : > { %v257_v17 = vld [vmem:[%s1317_s26] sm:$0xff]  ;;  %v258_v18 = vld [vmem:[%s1317_s26 + $0x8] sm:$0xff]  ;;  %v260_v24 = vld [vmem:[%s1317_s26 + $0x18] sm:$0xff]  ;;  %p246_p7 = scmp.lt.s32.totalorder %s1105_s16, 1  ;;  %v300_v42 = vshrl.u32 %v299_v41, 7  ;;  %s1370_s24 = scalar_lea.vmem [#allocation7], %s763_s30 }
  0x7d   : > { %392 = vmatpush1.bf16.msra.mxu0 %v940_v4  ;;  %837 = vmatpush1.bf16.msra.mxu1 %v940_v4  ;;  %v265_v19 = vld [vmem:[%s1317_s26 + $0x40] sm:$0xff]  ;;  %v266_v20 = vld [vmem:[%s1317_s26 + $0x48] sm:$0xff]  ;;  %v273_v21 = vpack.c.bf16 %v258_v18, %v257_v17  ;;  %v267_v25 = vld [vmem:[%s1317_s26 + $0x50] sm:$0xff]  ;;  %v274_v27 = vpack.c.bf16 %v260_v24, %v259_v23  ;;  %s615_s11 = scalar_lea.sflag [#allocation4], %s1311_s10  ;;  %p1511_p11 = scmp.ne.s32.totalorder %s1502_s29, 0 }
  0x7e   : > { %393 = vmatprep.subr.bf16.mxu0 %v941_v5  ;;  %830 = vmatprep.subr.bf16.mxu1 %v941_v5  ;;  %v277_v22 = vpack.c.bf16 %v266_v20, %v265_v19  ;;  %v268_v26 = vld [vmem:[%s1317_s26 + $0x58] sm:$0xff]  ;;  %v261_v29 = vld [vmem:[%s1317_s26 + $0x20] sm:$0xff]  ;;  %v262_v30 = vld [vmem:[%s1317_s26 + $0x28] sm:$0xff]  ;;  %s247_s22 = scalar_select %p246_p7, %s1105_s16, 1  ;;  %v301_v43 = vsub.s32 0, %v300_v42  ;;  %v305_v45 = vsub.s32 1, %v300_v42 }
  0x7f   : > { %v278_v28 = vpack.c.bf16 %v268_v26, %v267_v25  ;;  %v269_v31 = vld [vmem:[%s1317_s26 + $0x60] sm:$0xff]  ;;  %v270_v32 = vld [vmem:[%s1317_s26 + $0x68] sm:$0xff]  ;;  %v275_v33 = vpack.c.bf16 %v262_v30, %v261_v29  ;;  %v263_v35 = vld [vmem:[%s1317_s26 + $0x30] sm:$0xff]  ;;  %s800_s1 = sshll.u32 (%p1511_p11), %s1101_s15, 4 }
  0x80   : > { %v279_v34 = vpack.c.bf16 %v270_v32, %v269_v31  ;;  %v264_v36 = vld [vmem:[%s1317_s26 + $0x38] sm:$0xff]  ;;  %v271_v37 = vld [vmem:[%s1317_s26 + $0x70] sm:$0xff]  ;;  %s766_s23 = sshll.u32 %s247_s22, 1  ;;  %s623_s20 = ssub.s32 (%p1511_p11), 25, %s800_s1 }
  0x81   : > { %394 = vmatpush1.bf16.msra.mxu0 %v943_v6  ;;  %838 = vmatpush1.bf16.msra.mxu1 %v943_v6  ;;  %v272_v38 = vld [vmem:[%s1317_s26 + $0x78] sm:$0xff]  ;;  %v276_v39 = vpack.c.bf16 %v264_v36, %v263_v35  ;;  %s249_s7 = scalar_lea.vmem %s1488_s2, %s766_s23  ;;  %p624_p12 = scmp.lt.s32.totalorder (%p1511_p11), %s623_s20, 16 }
  0x82   : > { %395 = vmatprep.subr.bf16.mxu0 %v944_v7  ;;  %831 = vmatprep.subr.bf16.mxu1 %v944_v7  ;;  %v280_v40 = vpack.c.bf16 %v272_v38, %v271_v37  ;;  %v297_v44 = vld [vmem:[%s249_s7] sm:$0x3] }
  0x83   : > { %v1356_v46 = vrot.slane %v297_v44, %v301_v43  ;;  %v1358_v47 = vrot.slane %v297_v44, %v305_v45 }
  0x85   : > { %396 = vmatpush1.bf16.msra.mxu0 %v946_v8  ;;  %839 = vmatpush1.bf16.msra.mxu1 %v946_v8 }
  0x86   : > { %397 = vmatprep.subr.bf16.mxu0 %v947_v9  ;;  %832 = vmatprep.subr.bf16.mxu1 %v947_v9 }
  0x89   : > { %398 = vmatpush1.bf16.msra.mxu0 %v949_v10  ;;  %840 = vmatpush1.bf16.msra.mxu1 %v949_v10 }
  0x8a   : > { %399 = vmatprep.subr.bf16.mxu0 %v950_v11  ;;  %833 = vmatprep.subr.bf16.mxu1 %v950_v11 }
  0x8d   : > { %400 = vmatpush1.bf16.msra.mxu0 %v952_v12  ;;  %841 = vmatpush1.bf16.msra.mxu1 %v952_v12 }
  0x8e   : > { %401 = vmatprep.subr.bf16.mxu0 %v953_v13  ;;  %834 = vmatprep.subr.bf16.mxu1 %v953_v13 }
  0x91   : > { %402 = vmatpush1.bf16.msra.mxu0 %v955_v14  ;;  %842 = vmatpush1.bf16.msra.mxu1 %v955_v14 }
  0x92   : > { %403 = vmatprep.subr.bf16.mxu0 %v956_v15  ;;  %835 = vmatprep.subr.bf16.mxu1 %v956_v15 }
  0x95   : > { %404 = vmatpush1.bf16.msra.mxu0 %v958_v16  ;;  %843 = vmatpush1.bf16.msra.mxu1 %v958_v16 }
  0x98   : > { %422 = vmatmul.mubr.bf16.vlgmr.msra.gmra.mrb[0].mxu0 %v273_v21  ;;  %462 = vmatmul.mubr.bf16.vlgmr.msra.gmra.mrb[0].mxu1 %v277_v22 }
  0x99   : > { %431 = vmatprep.mubr.bf16.mxu0 %v1125_v0  ;;  %471 = vmatprep.mubr.bf16.mxu1 %v1125_v0 }
  0xa0   : > { %432 = vmatmul.mubr.bf16.gmra.mrb[4].mxu0 %v274_v27  ;;  %472 = vmatmul.mubr.bf16.gmra.mrb[4].mxu1 %v278_v28 }
  0xa1   : > { %441 = vmatprep.mubr.bf16.mxu0 %v1125_v0  ;;  %481 = vmatprep.mubr.bf16.mxu1 %v1125_v0 }
  0xa8   : > { %442 = vmatmul.mubr.bf16.gmra.mrb[8].mxu0 %v275_v33  ;;  %482 = vmatmul.mubr.bf16.gmra.mrb[8].mxu1 %v279_v34 }
  0xa9   : > { %451 = vmatprep.mubr.bf16.mxu0 %v1125_v0  ;;  %491 = vmatprep.mubr.bf16.mxu1 %v1125_v0 }
  0xb0   : > { %452 = vmatmul.mubr.bf16.gmra.mrb[12].mxu0 %v276_v39  ;;  %492 = vmatmul.mubr.bf16.gmra.mrb[12].mxu1 %v280_v40 }
 0x16b   : > { %v423_v48 = vpop.f32.mrb[0].mxu0  ;;  %v463_v49 = vpop.f32.mrb[0].mxu1 }
 0x16c   : > { %v424_v50 = vadd.f32 %v423_v48, %v1356_v46  ;;  %v464_v51 = vadd.f32 %v463_v49, %v1356_v46  ;;  %v425_v52 = vpop.f32.mrb[1].mxu0  ;;  %v465_v53 = vpop.f32.mrb[1].mxu1 }
 0x16d   : > { %v426_v54 = vadd.f32 %v425_v52, %v1358_v47  ;;  %v466_v55 = vadd.f32 %v465_v53, %v1358_v47  ;;  %v427_v56 = vpop.f32.mrb[2].mxu0  ;;  %v467_v57 = vpop.f32.mrb[2].mxu1 }
 0x16e   : > { %v428_v58 = vadd.f32 %v427_v56, %v1356_v46  ;;  %v468_v59 = vadd.f32 %v467_v57, %v1356_v46  ;;  %v429_v60 = vpop.f32.mrb[3].mxu0  ;;  %v469_v61 = vpop.f32.mrb[3].mxu1 }
 0x16f   : > { %v810_v62 = vpack.c.bf16 %v426_v54, %v424_v50  ;;  %v818_v63 = vpack.c.bf16 %v466_v55, %v464_v51  ;;  %v430_v0 = vadd.f32 %v429_v60, %v1358_v47  ;;  %v470_v1 = vadd.f32 %v469_v61, %v1358_v47 }
 0x171   : > { %598 = vst [vmem:[%s1370_s24] sm:$0xff] %v810_v62  ;;  %606 = vst [vmem:[%s1370_s24 + $0x40] sm:$0xff] %v818_v63  ;;  %v811_v2 = vpack.c.bf16 %v430_v0, %v428_v58  ;;  %v819_v3 = vpack.c.bf16 %v470_v1, %v468_v59 }
 0x173   : > { %599 = vst [vmem:[%s1370_s24 + $0x8] sm:$0xff] %v811_v2  ;;  %607 = vst [vmem:[%s1370_s24 + $0x48] sm:$0xff] %v819_v3  ;;  %v433_v4 = vpop.f32.mrb[4].mxu0  ;;  %v473_v5 = vpop.f32.mrb[4].mxu1 }
 0x174   : > { %v434_v6 = vadd.f32 %v433_v4, %v1356_v46  ;;  %v474_v7 = vadd.f32 %v473_v5, %v1356_v46  ;;  %v435_v8 = vpop.f32.mrb[5].mxu0  ;;  %v475_v9 = vpop.f32.mrb[5].mxu1 }
 0x175   : > { %v436_v10 = vadd.f32 %v435_v8, %v1358_v47  ;;  %v476_v11 = vadd.f32 %v475_v9, %v1358_v47  ;;  %v437_v12 = vpop.f32.mrb[6].mxu0  ;;  %v477_v13 = vpop.f32.mrb[6].mxu1 }
 0x176   : > { %v438_v14 = vadd.f32 %v437_v12, %v1356_v46  ;;  %v478_v15 = vadd.f32 %v477_v13, %v1356_v46  ;;  %v439_v16 = vpop.f32.mrb[7].mxu0  ;;  %v479_v17 = vpop.f32.mrb[7].mxu1 }
 0x177   : > { %v812_v18 = vpack.c.bf16 %v436_v10, %v434_v6  ;;  %v820_v19 = vpack.c.bf16 %v476_v11, %v474_v7  ;;  %v440_v20 = vadd.f32 %v439_v16, %v1358_v47  ;;  %v480_v21 = vadd.f32 %v479_v17, %v1358_v47 }
 0x179   : > { %600 = vst [vmem:[%s1370_s24 + $0x10] sm:$0xff] %v812_v18  ;;  %608 = vst [vmem:[%s1370_s24 + $0x50] sm:$0xff] %v820_v19  ;;  %v813_v22 = vpack.c.bf16 %v440_v20, %v438_v14  ;;  %v821_v23 = vpack.c.bf16 %v480_v21, %v478_v15 }
 0x17b   : > { %601 = vst [vmem:[%s1370_s24 + $0x18] sm:$0xff] %v813_v22  ;;  %609 = vst [vmem:[%s1370_s24 + $0x58] sm:$0xff] %v821_v23  ;;  %v443_v24 = vpop.f32.mrb[8].mxu0  ;;  %v483_v25 = vpop.f32.mrb[8].mxu1 }
 0x17c   : > { %v444_v26 = vadd.f32 %v443_v24, %v1356_v46  ;;  %v484_v27 = vadd.f32 %v483_v25, %v1356_v46  ;;  %v445_v28 = vpop.f32.mrb[9].mxu0  ;;  %v485_v29 = vpop.f32.mrb[9].mxu1 }
 0x17d   : > { %v446_v30 = vadd.f32 %v445_v28, %v1358_v47  ;;  %v486_v31 = vadd.f32 %v485_v29, %v1358_v47  ;;  %v447_v32 = vpop.f32.mrb[10].mxu0  ;;  %v487_v33 = vpop.f32.mrb[10].mxu1 }
 0x17e   : > { %v448_v34 = vadd.f32 %v447_v32, %v1356_v46  ;;  %v488_v35 = vadd.f32 %v487_v33, %v1356_v46  ;;  %v449_v36 = vpop.f32.mrb[11].mxu0  ;;  %v489_v37 = vpop.f32.mrb[11].mxu1 }
 0x17f   : > { %v814_v38 = vpack.c.bf16 %v446_v30, %v444_v26  ;;  %v822_v39 = vpack.c.bf16 %v486_v31, %v484_v27  ;;  %v450_v40 = vadd.f32 %v449_v36, %v1358_v47  ;;  %v490_v41 = vadd.f32 %v489_v37, %v1358_v47 }
 0x181   : > { %602 = vst [vmem:[%s1370_s24 + $0x20] sm:$0xff] %v814_v38  ;;  %610 = vst [vmem:[%s1370_s24 + $0x60] sm:$0xff] %v822_v39  ;;  %v815_v42 = vpack.c.bf16 %v450_v40, %v448_v34  ;;  %v823_v43 = vpack.c.bf16 %v490_v41, %v488_v35 }
 0x183   : > { %603 = vst [vmem:[%s1370_s24 + $0x28] sm:$0xff] %v815_v42  ;;  %611 = vst [vmem:[%s1370_s24 + $0x68] sm:$0xff] %v823_v43  ;;  %v453_v44 = vpop.f32.mrb[12].mxu0  ;;  %v493_v45 = vpop.f32.mrb[12].mxu1 }
 0x184   : > { %v454_v48 = vadd.f32 %v453_v44, %v1356_v46  ;;  %v494_v49 = vadd.f32 %v493_v45, %v1356_v46  ;;  %v455_v50 = vpop.f32.mrb[13].mxu0  ;;  %v495_v51 = vpop.f32.mrb[13].mxu1 }
 0x185   : > { %v456_v52 = vadd.f32 %v455_v50, %v1358_v47  ;;  %v496_v53 = vadd.f32 %v495_v51, %v1358_v47  ;;  %v457_v54 = vpop.f32.mrb[14].mxu0  ;;  %v497_v55 = vpop.f32.mrb[14].mxu1  ;;  %621 = sbr.rel (!%p1511_p11) target bundleno = 426 (0x1aa), region = 44 }
 0x186   : > { %v458_v56 = vadd.f32 %v457_v54, %v1356_v46  ;;  %v498_v57 = vadd.f32 %v497_v55, %v1356_v46  ;;  %v459_v58 = vpop.f32.mrb[15].mxu0  ;;  %v499_v59 = vpop.f32.mrb[15].mxu1 }
 0x187   : > { %v816_v60 = vpack.c.bf16 %v456_v52, %v454_v48  ;;  %v824_v61 = vpack.c.bf16 %v496_v53, %v494_v49  ;;  %v460_v62 = vadd.f32 %v459_v58, %v1358_v47  ;;  %v500_v63 = vadd.f32 %v499_v59, %v1358_v47 }
 0x189   : > { %604 = vst [vmem:[%s1370_s24 + $0x30] sm:$0xff] %v816_v60  ;;  %612 = vst [vmem:[%s1370_s24 + $0x70] sm:$0xff] %v824_v61  ;;  %v817_v0 = vpack.c.bf16 %v460_v62, %v458_v56  ;;  %v825_v1 = vpack.c.bf16 %v500_v63, %v498_v57 }
 0x18b   : > { %605 = vst [vmem:[%s1370_s24 + $0x38] sm:$0xff] %v817_v0  ;;  %613 = vst [vmem:[%s1370_s24 + $0x78] sm:$0xff] %v825_v1 }
 0x18c   : > { %s1531_s20 = smov (!%p624_p12, %s623_s20), 16 }
 0x18d   : > { %s1416_s25 = sshll.u32 %s1531_s20, 7 }
 0x18e   : > { %s629_s8 = ssub.s32 2048, %s1416_s25 }
 0x18f   : > { %630 = vsyncadd %s615_s11, %s629_s8  ;;  %p803_p0 = scmp.ne.s32.totalorder %s1416_s25, 0  ;;  %s827_s29 = sshll.u32 %s1101_s15, 5 }
 0x190   : > { %s845_s21 = smul.u32 50, %s1105_s16  ;;  %s638_s4 = sshll.u32 %s1370_s24, 4  ;;  %s1425_s4 = int_to_ptr.vmem [resolvable:$true] %s638_s4 }
 0x191   : > { %s1015_s27 = scalar_lea.vmem %s1425_s4, %s1416_s25  ;;  %s1126_s15 = smov [#allocation7]  }
 0x192   : > { %s634_s30 = sadd.s32 %s845_s21, %s827_s29  ;;  %p1016_p1 = scmp.ne.s32.totalorder %s1425_s4, %s1015_s27 }
 0x193   : > { %s805_s9 = sshll.u32 %s634_s30, 6  ;;  %s1019_s16 = sshll.u32 %s1126_s15, 4  ;;  %s1020_s16 = int_to_ptr.vmem [resolvable:$false] %s1019_s16 }
 0x194   : > { %s1430_s23 = scalar_lea.hbm %s1489_s3, %s805_s9  ;;  %p1017_p5 = pnand %p1016_p1, %p803_p0 }
 0x195   : > { %s1021_s28 = scalar_lea.vmem %s1020_s16, 4096  ;;  %p1022_p3 = scmp.lt.s32.totalorder %s1425_s4, %s1020_s16 }
 0x196   : > { %p1018_p10 = pneg %p1017_p5  ;;  %p1023_p8 = scmp.lt.s32.totalorder %s1021_s28, %s1015_s27 }
 0x198   : > { %p1024_p9 = por %p1023_p8, %p1022_p3 }
 0x19a   : > { %p1025_p2 = pnand %p1024_p9, %p1018_p10 }
 0x19c   : > { %1028 = shalt.err (!%p1025_p2)
}
 0x19d   : > { %s1029_s7 = scalar_lea.hbm %s1430_s23, %s1416_s25  ;;  %s1033_s20 = scalar_lea.hbm %s1489_s3, 6400 }
 0x19e   : > { %p1030_p13 = scmp.ne.s32.totalorder %s1430_s23, %s1029_s7  ;;  %p1034_p7 = scmp.lt.u32.totalorder %s1430_s23, %s1489_s3 }
 0x19f   : > { %p1035_p11 = scmp.lt.u32.totalorder %s1033_s20, %s1029_s7  ;;  %p1037_p1 = scmp.lt.u32.totalorder %s1029_s7, %s1430_s23 }
 0x1a0   : > { %p1031_p4 = pnand %p1030_p13, %p803_p0 }
 0x1a1   : > { %p1036_p12 = por %p1035_p11, %p1034_p7 }
 0x1a2   : > { %p1032_p6 = pneg %p1031_p4 }
 0x1a3   : > { %p1038_p5 = por %p1037_p1, %p1036_p12 }
 0x1a5   : > { %p1039_p10 = pnand %p1038_p5, %p1032_p6 }
 0x1a7   : > { %1042 = shalt.err (!%p1039_p10)
}
 0x1a8   : > { %s1127_s21 = smov 128   ;;  %s1128_s30 = smov 8  }
 0x1a9   : > { %644 = dma.vmem_to_hbm [thread:$0]  (%p803_p0), %s1425_s4, %s1416_s25, %s1430_s23, %s615_s11, %s1127_s21, %s1127_s21, %s1128_s30  }
 0x1aa PF: > { %p862_p3 = scmp.ge.s32.totalorder %s1117_s19, 2  ;;  %s653_s9 = sand.u32 1, %s1089_s12  }
 0x1ab   : > { %p1512_p8 = scmp.ne.s32.totalorder %s1503_s5, 0  ;;  %s654_s26 = scalar_lea.sflag [#allocation4], %s653_s9 }
 0x1ad   : > { %p857_p9 = pnand %p862_p3, %p1512_p8 }
 0x1af   : > { %1084 = dma.done.wait (!%p857_p9), %s654_s26, 2048  }
 0x1b0   : > { %1086 = vsyncadd (!%p857_p9), %s654_s26, 4294965248  ;;  %s20_s19 = sadd.s32 1, %s1117_s19   ;;  %s1513_s10 = sld [smem:[#allocation11_spill]] }
 0x1b1   : > { %p17_p2 = scmp.ge.s32.totalorder %s20_s19, 6   ;;  %s1514_s11 = sld [smem:[#allocation12_spill]] }
 0x1b2   : > { %s1515_s12 = smov %s1093_s13  ;;  %s1516_s13 = smov %s1097_s14 }
 0x1b3   : > { %s1517_s14 = smov %s1233_s6  ;;  %s1518_s15 = smov %s1109_s17 }
 0x1b4   : > { %s1519_s16 = smov %s1113_s18  ;;  %19 = sbr.rel (!%p17_p2) target bundleno = 10 (0xa), region = 84 }
 0x1b6   : > { %s1520_s17 = smov %s1513_s10 }
 0x1b7   : > { %s1521_s18 = smov %s1514_s11 }
 0x1bb   :  { %659 = vsyncpa [#allocation3], 1 }
 0x1bc   :  { %661 = vsyncpa [#allocation3 + $0x1], 1 }
 0x1bd   :  { %662 = vsyncpa [#allocation6], 1 }
 0x1be   :  { %663 = vsyncpa [#allocation4], 1 }
 0x1bf   :  { %665 = vsyncpa [#allocation4 + $0x1], 1 }

</bundles_post_ra>
